<compile_context>
chip_gen: v6e
topology: v6e:2x2x1
jax: 0.10.0
libtpu: 0.0.40
codegen_flags: <defaults>
</compile_context>

<pallas_src>
import functools

import jax
import jax.numpy as jnp
from jax.experimental import pallas as pl
from jax.experimental.pallas import tpu as pltpu


_NEG_SLOPE = 0.01   # nn.LeakyReLU() default negative_slope
_LANE = 128
_SUBLANE = 8


def _cdiv(a, b):
    return (a + b - 1) // b


def _round_up(x, m):
    return _cdiv(x, m) * m


def _mlp_readout_kernel(x_ref, w0_ref, cc_ref, w1_ref, ws_ref, bm_ref,
                        out_ref, acc_ref):
    k = pl.program_id(1)

    @pl.when(k == 0)
    def _():
        acc_ref[...] = jnp.zeros_like(acc_ref)

    # Layer 0 (partial-K) matmul: bf16 operands on the MXU, f32 accumulation.
    x_blk = x_ref[...]
    if x_blk.dtype != jnp.bfloat16:          # tiny-batch f32 fallback path
        x_blk = x_blk.astype(jnp.bfloat16)
    acc_ref[...] += jnp.dot(x_blk, w0_ref[...], preferred_element_type=jnp.float32)

    @pl.when(k == pl.num_programs(1) - 1)
    def _():
        d2 = w1_ref.shape[1]
        cc = cc_ref[...]
        bm = bm_ref[...]

        # Layer 0 epilogue: folded Linear-bias / BN shift + LeakyReLU (f32 VPU).
        h = acc_ref[...] + cc[0:1, :]
        h = jnp.where(h > 0, h, _NEG_SLOPE * h)

        # Layer 1: resident bf16 weights, f32 accumulate, folded shift, LeakyReLU.
        h = jnp.dot(h.astype(jnp.bfloat16), w1_ref[...],
                    preferred_element_type=jnp.float32) + cc[1:2, :d2]
        h = jnp.where(h > 0, h, _NEG_SLOPE * h)

        # Both heads folded into one lane-dense 128-wide bf16 slab matmul:
        #   cols [0,4)            = y2 = h @ wc + bc
        #   cols [4,4+output_dim) = z  = h @ (wc@wl) + (bc@wl + bl)
        slab = jnp.dot(h.astype(jnp.bfloat16), ws_ref[...],
                       preferred_element_type=jnp.float32) + bm[0:1, :]
        sig = 1.0 / (1.0 + jnp.exp(-slab))          # exp on the EUP
        out_ref[...] = jnp.where(bm[1:2, :] > 0, sig, slab)


def prepare_params(params, output_dim):
    """One-time (offline) parameter transform."""
    slab_w = max(_LANE, _round_up(4 + output_dim, _LANE))

    # Fold Linear bias + eval-mode BN:  (xW + b)*s + t == x(W*s) + (b*s + t)
    w0 = (params["w0"] * params["s0"]).astype(jnp.bfloat16)
    c0 = (params["b0"] * params["s0"] + params["t0"]).astype(jnp.float32)
    w1 = (params["w1"] * params["s1"]).astype(jnp.bfloat16)
    c1 = (params["b1"] * params["s1"] + params["t1"]).astype(jnp.float32)
    d1, d2 = w0.shape[1], w1.shape[1]

    # Fold BOTH heads into one lane-dense slab matmul.
    wz = params["wc"] @ params["wl"]
    bz = params["bc"] @ params["wl"] + params["bl"]
    w_slab = jnp.zeros((d2, slab_w), jnp.float32)
    w_slab = w_slab.at[:, :4].set(params["wc"]).at[:, 4:4 + output_dim].set(wz)
    b_slab = jnp.zeros((1, slab_w), jnp.float32)
    b_slab = b_slab.at[:, :4].set(params["bc"]).at[:, 4:4 + output_dim].set(bz)
    mask = jnp.zeros((1, slab_w), jnp.float32).at[:, 4:4 + output_dim].set(1.0)

    # Pack tiny per-feature rows to cut BlockSpec / DMA-descriptor count:
    #   cc row 0 = c0 (width d1), row 1[:d2] = c1 ; bm row 0 = slab bias, row 1 = mask
    cc = jnp.zeros((2, d1), jnp.float32).at[0, :].set(c0[0]).at[1, :d2].set(c1[0])
    bm = jnp.concatenate([b_slab, mask], axis=0)

    return dict(w0=w0, w1=w1, w_slab=w_slab.astype(jnp.bfloat16), cc=cc, bm=bm)


def mlp_readout_class_v2(x, prepped, *, output_dim, tile_n=512, tile_k=None,
                         single_buffer_weights=True):
    """Pallas forward for MLPReadoutClassV2 (L=2, inference semantics)."""
    n, d = x.shape
    w0, w1, ws = prepped["w0"], prepped["w1"], prepped["w_slab"]
    cc, bm = prepped["cc"], prepped["bm"]
    d1, d2, slab_w = w0.shape[1], w1.shape[1], ws.shape[1]
    assert w0.shape[0] == d and 4 + output_dim <= slab_w

    # bf16 x halves the dominant HBM->VMEM DMA (f32 MXU accumulation preserved).
    # bf16 blocks use a 16-row sublane granule; tiny batches keep f32 x.
    sub = 16 if n >= 16 else _SUBLANE
    if sub == 16 and x.dtype != jnp.bfloat16:
        x = x.astype(jnp.bfloat16)   # ideally the upstream producer already emits bf16

    # Per-TensorCore VMEM budget with ~25% headroom (64 MiB on v7x, 128 on v5e/v6e).
    try:
        vmem_cap = int(pltpu.get_tpu_info().vmem_capacity_bytes)
    except Exception:
        vmem_cap = 64 * 2**20
    vmem_budget = int(0.75 * vmem_cap)

    # K-tile layer 0 only when the resident bf16 w0 would not fit comfortably.
    if tile_k is None:
        tile_k = d
        while (tile_k * d1 * 2 > vmem_budget // 3 and tile_k % 2 == 0
               and (tile_k // 2) % _LANE == 0):
            tile_k //= 2
        # TODO(synk): input_dim that does not factor into 128-aligned chunks falls
        # back to a single K block and relies on the larger vmem_limit instead.
    assert tile_k == d or (tile_k % _LANE == 0 and d % tile_k == 0)
    k_tiles = _cdiv(d, tile_k)

    # Batch tiling: big tiles amortize the ~0.35us/step overhead; >=2 steps when
    # possible so the "parallel" axis feeds both v7x TensorCores.
    tile_n = int(min(tile_n, max(sub, _round_up(_cdiv(n, 2), sub))))
    grid = (_cdiv(n, tile_n), k_tiles)   # ragged last batch tile = partial block

    # Resident (constant-index) blocks: single-buffered to halve their VMEM.
    w0_mode = pl.Buffered(1) if (single_buffer_weights and k_tiles == 1) else None
    res_mode = pl.Buffered(1) if single_buffer_weights else None

    def spec(shape, index_map, mode=None):
        if mode is None:
            return pl.BlockSpec(shape, index_map)
        return pl.BlockSpec(shape, index_map, pipeline_mode=mode)

    in_specs = [
        spec((tile_n, tile_k), lambda i, k: (i, k)),
        spec((tile_k, d1), lambda i, k: (k, 0), w0_mode),
        spec(cc.shape, lambda i, k: (0, 0), res_mode),
        spec(w1.shape, lambda i, k: (0, 0), res_mode),
        spec(ws.shape, lambda i, k: (0, 0), res_mode),
        spec(bm.shape, lambda i, k: (0, 0), res_mode),
    ]
    out_specs = spec((tile_n, slab_w), lambda i, k: (i, 0))

    x_bytes = x.dtype.itemsize
    param_bytes = (w0.size + w1.size + ws.size) * 2 + (cc.size + bm.size) * 4
    resident = (tile_k * d1 * 2 * (1 if w0_mode is not None else 2)
                + w1.size * 2 + ws.size * 2 + (cc.size + bm.size) * 4)
    streamed = 2 * tile_n * (tile_k * x_bytes + slab_w * 4)      # double-buffered x/out
    live = tile_n * (2 * d1 + d2 + 2 * slab_w) * 4               # acc scratch + temps
    est_vmem = resident + streamed + live
    vmem_limit = int(min(vmem_budget, max(16 * 2**20, 2 * est_vmem)))

    flops = 2 * n * (d * d1 + d1 * d2 + d2 * slab_w)
    bytes_accessed = int(x.size) * x_bytes + n * slab_w * 4 + param_bytes

    slab = pl.pallas_call(
        _mlp_readout_kernel,
        out_shape=jax.ShapeDtypeStruct((n, slab_w), jnp.float32),
        grid=grid,
        in_specs=in_specs,
        out_specs=out_specs,
        scratch_shapes=[pltpu.VMEM((tile_n, d1), jnp.float32)],
        compiler_params=pltpu.CompilerParams(
            dimension_semantics=("parallel", "arbitrary"),
            vmem_limit_bytes=vmem_limit),
        cost_estimate=pl.CostEstimate(flops=flops, transcendentals=n * slab_w,
                                      bytes_accessed=bytes_accessed),
    )(x, w0, cc, w1, ws, bm)

    y2 = slab[:, 0:4]
    y1 = slab[:, 4:4 + output_dim]
    return y1, y2


def run_forward(x, prepped, **kw):
    """JIT + run, falling back to default buffering if Buffered(1) is unsupported."""
    try:
        fwd = jax.jit(functools.partial(mlp_readout_class_v2,
                                        single_buffer_weights=True, **kw))
        y1, y2 = fwd(x, prepped)
        jax.block_until_ready((y1, y2))
        return y1, y2
    except Exception:
        fwd = jax.jit(functools.partial(mlp_readout_class_v2,
                                        single_buffer_weights=False, **kw))
        y1, y2 = fwd(x, prepped)
        jax.block_until_ready((y1, y2))
        return y1, y2


def init_params(input_dim, output_dim, key):
    """Deterministic synthetic parameters matching the PyTorch module shapes."""
    ks = jax.random.split(key, 16)
    eps = 1e-5
    d0, d1, d2 = input_dim, input_dim // 2, input_dim // 4

    def lin(kw, kb, fan_in, fan_out):
        w = jax.random.normal(kw, (fan_in, fan_out), jnp.float32) * 0.1
        b = jax.random.normal(kb, (1, fan_out), jnp.float32) * 0.1
        return w, b

    def bn(kg, kb, km, kv, dim):
        gamma = 1.0 + 0.1 * jax.random.normal(kg, (1, dim), jnp.float32)
        beta = 0.1 * jax.random.normal(kb, (1, dim), jnp.float32)
        mean = 0.1 * jax.random.normal(km, (1, dim), jnp.float32)
        var = 1.0 + 0.1 * jnp.abs(jax.random.normal(kv, (1, dim), jnp.float32))
        scale = gamma / jnp.sqrt(var + eps)
        shift = beta - mean * scale
        return scale, shift

    w0, b0 = lin(ks[0], ks[1], d0, d1)
    s0, t0 = bn(ks[2], ks[3], ks[4], ks[5], d1)
    w1, b1 = lin(ks[6], ks[7], d1, d2)
    s1, t1 = bn(ks[8], ks[9], ks[10], ks[11], d2)
    wc, bc = lin(ks[12], ks[13], d2, 4)
    wl, bl = lin(ks[14], ks[15], 4, output_dim)

    return dict(w0=w0, b0=b0, s0=s0, t0=t0,
                w1=w1, b1=b1, s1=s1, t1=t1,
                wc=wc, bc=bc, wl=wl, bl=bl)


def reference_forward(x, p, *, mimic_kernel=False):
    """Pure-JAX reference mirroring the PyTorch forward (eval mode).

    mimic_kernel=True reproduces the kernel's bf16 operands / folded heads
    (f32 accumulation) for a tight numerical comparison.
    """
    def leaky(h):
        return jnp.where(h > 0, h, _NEG_SLOPE * h)

    w0 = p["w0"] * p["s0"]
    c0 = p["b0"] * p["s0"] + p["t0"]
    w1 = p["w1"] * p["s1"]
    c1 = p["b1"] * p["s1"] + p["t1"]

    if mimic_kernel:
        bf = lambda a: a.astype(jnp.bfloat16)
        h = leaky(jnp.dot(bf(x), bf(w0), preferred_element_type=jnp.float32) + c0)
        h = leaky(jnp.dot(bf(h), bf(w1), preferred_element_type=jnp.float32) + c1)
        wz = p["wc"] @ p["wl"]
        bz = p["bc"] @ p["wl"] + p["bl"]
        y2 = jnp.dot(bf(h), bf(p["wc"]), preferred_element_type=jnp.float32) + p["bc"]
        z = jnp.dot(bf(h), bf(wz), preferred_element_type=jnp.float32) + bz
        y1 = 1.0 / (1.0 + jnp.exp(-z))
        return y1, y2

    h = leaky(x @ w0 + c0)
    h = leaky(h @ w1 + c1)
    y2 = h @ p["wc"] + p["bc"]
    y1 = 1.0 / (1.0 + jnp.exp(-(y2 @ p["wl"] + p["bl"])))
    return y1, y2


if __name__ == "__main__":
    key = jax.random.PRNGKey(0)
    k1, k2, k3, k4 = jax.random.split(key, 4)

    # --- Test 1: small shapes, fully-resident weights, single K block. ---
    input_dim, output_dim, batch = 32, 2, 16
    x = jax.random.normal(k1, (batch, input_dim), jnp.float32)
    params = init_params(input_dim, output_dim, k2)
    prepped = prepare_params(params, output_dim)

    y1, y2 = run_forward(x, prepped, output_dim=output_dim)
    assert y1.shape == (batch, output_dim) and y2.shape == (batch, 4)

    m1, m2 = reference_forward(x, params, mimic_kernel=True)
    assert jnp.allclose(y2, m2, atol=3e-3, rtol=3e-3)
    assert jnp.allclose(y1, m1, atol=3e-3, rtol=3e-3)

    f1, f2 = reference_forward(x, params, mimic_kernel=False)
    assert jnp.allclose(y2, f2, atol=5e-2, rtol=5e-2)
    assert jnp.allclose(y1, f1, atol=5e-2, rtol=5e-2)

    # --- Test 2: forced K-tiling (accumulator path) + ragged last batch tile. ---
    input_dim2, output_dim2, batch2 = 512, 3, 24
    x2 = jax.random.normal(k3, (batch2, input_dim2), jnp.float32)
    params2 = init_params(input_dim2, output_dim2, k4)
    prepped2 = prepare_params(params2, output_dim2)

    y1b, y2b = run_forward(x2, prepped2, output_dim=output_dim2, tile_k=128)
    assert y1b.shape == (batch2, output_dim2) and y2b.shape == (batch2, 4)

    m1b, m2b = reference_forward(x2, params2, mimic_kernel=True)
    assert jnp.allclose(y2b, m2b, atol=3e-3, rtol=3e-3)
    assert jnp.allclose(y1b, m1b, atol=3e-3, rtol=3e-3)

    print("KERNEL_OK")
</pallas_src>

<mosaic_0001>
module attributes {stable_mosaic.version = 11 : i64} {
  func.func @_mlp_readout_kernel(%arg0: i32, %arg1: i32, %arg2: memref<16x32xbf16, #tpu.memory_space<vmem>>, %arg3: memref<32x16xbf16, #tpu.memory_space<vmem>>, %arg4: memref<2x16xf32, #tpu.memory_space<vmem>>, %arg5: memref<16x8xbf16, #tpu.memory_space<vmem>>, %arg6: memref<8x128xbf16, #tpu.memory_space<vmem>>, %arg7: memref<2x128xf32, #tpu.memory_space<vmem>>, %arg8: memref<16x128xf32, #tpu.memory_space<vmem>>, %arg9: memref<16x16xf32, #tpu.memory_space<vmem>>) attributes {dimension_semantics = [#tpu.dimension_semantics<parallel>, #tpu.dimension_semantics<arbitrary>], iteration_bounds = array<i64: 1, 1>, scalar_prefetch = 0 : i64, scratch_operands = 1 : i64, tpu.core_type = #tpu.core_type<tc>, window_params = [{transform_indices = @transform_0, window_bounds = array<i64: 16, 32>}, {pipeline_mode = #tpu.pipeline_mode<synchronous>, transform_indices = @transform_1, window_bounds = array<i64: 32, 16>}, {pipeline_mode = #tpu.pipeline_mode<synchronous>, transform_indices = @transform_2, window_bounds = array<i64: 2, 16>}, {pipeline_mode = #tpu.pipeline_mode<synchronous>, transform_indices = @transform_3, window_bounds = array<i64: 16, 8>}, {pipeline_mode = #tpu.pipeline_mode<synchronous>, transform_indices = @transform_4, window_bounds = array<i64: 8, 128>}, {pipeline_mode = #tpu.pipeline_mode<synchronous>, transform_indices = @transform_5, window_bounds = array<i64: 2, 128>}, {transform_indices = @transform_6, window_bounds = array<i64: 16, 128>}]} {
    %c0_i32 = arith.constant 0 : i32
    %0 = arith.cmpi eq, %arg1, %c0_i32 : i32
    %1 = arith.extui %0 : i1 to i32
    %c0_i32_0 = arith.constant 0 : i32
    %2 = arith.cmpi ne, %1, %c0_i32_0 : i32
    scf.if %2 {
      %cst_10 = arith.constant 0.000000e+00 : f32
      %12 = vector.broadcast %cst_10 : f32 to vector<16x16xf32>
      %c0_11 = arith.constant 0 : index
      %c0_12 = arith.constant 0 : index
      %13 = vector.load %arg9[%c0_11, %c0_12] : memref<16x16xf32, #tpu.memory_space<vmem>>, vector<16x16xf32>
      tpu.vector_store %arg9[%c0_11, %c0_12], %12 {strides = array<i32>} : memref<16x16xf32, #tpu.memory_space<vmem>>, vector<16x16xf32>,
    } else {
    }
    %c0 = arith.constant 0 : index
    %c0_1 = arith.constant 0 : index
    %3 = vector.load %arg2[%c0, %c0_1] : memref<16x32xbf16, #tpu.memory_space<vmem>>, vector<16x32xbf16>
    %c0_2 = arith.constant 0 : index
    %c0_3 = arith.constant 0 : index
    %4 = vector.load %arg9[%c0_2, %c0_3] : memref<16x16xf32, #tpu.memory_space<vmem>>, vector<16x16xf32>
    %c0_4 = arith.constant 0 : index
    %c0_5 = arith.constant 0 : index
    %5 = vector.load %arg3[%c0_4, %c0_5] : memref<32x16xbf16, #tpu.memory_space<vmem>>, vector<32x16xbf16>
    %cst = arith.constant dense<0.000000e+00> : vector<16x16xf32>
    %6 = tpu.matmul %3, %5, %cst {dimension_numbers = #tpu.dot_dimension_numbers<[1], [0], [0], [1], [0, 0, 1, 1], [], []>} : vector<16x32xbf16>, vector<32x16xbf16>, vector<16x16xf32> -> vector<16x16xf32>
    %7 = arith.addf %4, %6 : vector<16x16xf32>
    %c0_6 = arith.constant 0 : index
    %c0_7 = arith.constant 0 : index
    %8 = vector.load %arg9[%c0_6, %c0_7] : memref<16x16xf32, #tpu.memory_space<vmem>>, vector<16x16xf32>
    tpu.vector_store %arg9[%c0_6, %c0_7], %7 {strides = array<i32>} : memref<16x16xf32, #tpu.memory_space<vmem>>, vector<16x16xf32>,
    %c0_i32_8 = arith.constant 0 : i32
    %9 = arith.cmpi eq, %arg1, %c0_i32_8 : i32
    %10 = arith.extui %9 : i1 to i32
    %c0_i32_9 = arith.constant 0 : i32
    %11 = arith.cmpi ne, %10, %c0_i32_9 : i32
    scf.if %11 {
      %c0_10 = arith.constant 0 : index
      %c0_11 = arith.constant 0 : index
      %12 = vector.load %arg4[%c0_10, %c0_11] : memref<2x16xf32, #tpu.memory_space<vmem>>, vector<2x16xf32>
      %c0_12 = arith.constant 0 : index
      %c0_13 = arith.constant 0 : index
      %13 = vector.load %arg7[%c0_12, %c0_13] : memref<2x128xf32, #tpu.memory_space<vmem>>, vector<2x128xf32>
      %c0_14 = arith.constant 0 : index
      %c0_15 = arith.constant 0 : index
      %14 = vector.load %arg9[%c0_14, %c0_15] : memref<16x16xf32, #tpu.memory_space<vmem>>, vector<16x16xf32>
      %15 = vector.extract_strided_slice %12 {offsets = [0, 0], sizes = [1, 16], strides = [1, 1]} : vector<2x16xf32> to vector<1x16xf32>
      %16 = vector.broadcast %15 : vector<1x16xf32> to vector<16x16xf32>
      %17 = arith.addf %14, %16 : vector<16x16xf32>
      %cst_16 = arith.constant 0.000000e+00 : f32
      %18 = vector.broadcast %cst_16 : f32 to vector<16x16xf32>
      %19 = arith.cmpf ogt, %17, %18 : vector<16x16xf32>
      %cst_17 = arith.constant 0.00999999977 : f32
      %20 = vector.broadcast %cst_17 : f32 to vector<16x16xf32>
      %21 = arith.mulf %20, %17 : vector<16x16xf32>
      %22 = arith.select %19, %17, %21 : vector<16x16xi1>, vector<16x16xf32>
      %23 = arith.truncf %22 : vector<16x16xf32> to vector<16x16xbf16>
      %c0_18 = arith.constant 0 : index
      %c0_19 = arith.constant 0 : index
      %24 = vector.load %arg5[%c0_18, %c0_19] : memref<16x8xbf16, #tpu.memory_space<vmem>>, vector<16x8xbf16>
      %cst_20 = arith.constant dense<0.000000e+00> : vector<16x8xf32>
      %25 = tpu.matmul %23, %24, %cst_20 {dimension_numbers = #tpu.dot_dimension_numbers<[1], [0], [0], [1], [0, 0, 1, 1], [], []>} : vector<16x16xbf16>, vector<16x8xbf16>, vector<16x8xf32> -> vector<16x8xf32>
      %26 = vector.extract_strided_slice %12 {offsets = [1, 0], sizes = [1, 8], strides = [1, 1]} : vector<2x16xf32> to vector<1x8xf32>
      %27 = vector.broadcast %26 : vector<1x8xf32> to vector<16x8xf32>
      %28 = arith.addf %25, %27 : vector<16x8xf32>
      %cst_21 = arith.constant 0.000000e+00 : f32
      %29 = vector.broadcast %cst_21 : f32 to vector<16x8xf32>
      %30 = arith.cmpf ogt, %28, %29 : vector<16x8xf32>
      %cst_22 = arith.constant 0.00999999977 : f32
      %31 = vector.broadcast %cst_22 : f32 to vector<16x8xf32>
      %32 = arith.mulf %31, %28 : vector<16x8xf32>
      %33 = arith.select %30, %28, %32 : vector<16x8xi1>, vector<16x8xf32>
      %34 = arith.truncf %33 : vector<16x8xf32> to vector<16x8xbf16>
      %c0_23 = arith.constant 0 : index
      %c0_24 = arith.constant 0 : index
      %35 = vector.load %arg6[%c0_23, %c0_24] : memref<8x128xbf16, #tpu.memory_space<vmem>>, vector<8x128xbf16>
      %cst_25 = arith.constant dense<0.000000e+00> : vector<16x128xf32>
      %36 = tpu.matmul %34, %35, %cst_25 {dimension_numbers = #tpu.dot_dimension_numbers<[1], [0], [0], [1], [0, 0, 1, 1], [], []>} : vector<16x8xbf16>, vector<8x128xbf16>, vector<16x128xf32> -> vector<16x128xf32>
      %37 = vector.extract_strided_slice %13 {offsets = [0, 0], sizes = [1, 128], strides = [1, 1]} : vector<2x128xf32> to vector<1x128xf32>
      %38 = vector.broadcast %37 : vector<1x128xf32> to vector<16x128xf32>
      %39 = arith.addf %36, %38 : vector<16x128xf32>
      %cst_26 = arith.constant 0.000000e+00 : f32
      %40 = vector.broadcast %cst_26 : f32 to vector<16x128xf32>
      %41 = arith.subf %40, %39 : vector<16x128xf32>
      %42 = math.exp %41 : vector<16x128xf32>
      %cst_27 = arith.constant 1.000000e+00 : f32
      %43 = vector.broadcast %cst_27 : f32 to vector<16x128xf32>
      %44 = arith.addf %43, %42 : vector<16x128xf32>
      %cst_28 = arith.constant 1.000000e+00 : f32
      %45 = vector.broadcast %cst_28 : f32 to vector<16x128xf32>
      %46 = arith.divf %45, %44 : vector<16x128xf32>
      %47 = vector.extract_strided_slice %13 {offsets = [1, 0], sizes = [1, 128], strides = [1, 1]} : vector<2x128xf32> to vector<1x128xf32>
      %cst_29 = arith.constant 0.000000e+00 : f32
      %48 = vector.broadcast %cst_29 : f32 to vector<1x128xf32>
      %49 = arith.cmpf ogt, %47, %48 : vector<1x128xf32>
      %50 = vector.shape_cast %49 : vector<1x128xi1> to vector<1x128xi1>
      %51 = vector.broadcast %50 : vector<1x128xi1> to vector<16x128xi1>
      %52 = arith.select %51, %46, %39 : vector<16x128xi1>, vector<16x128xf32>
      %c0_30 = arith.constant 0 : index
      %c0_31 = arith.constant 0 : index
      %53 = vector.load %arg8[%c0_30, %c0_31] : memref<16x128xf32, #tpu.memory_space<vmem>>, vector<16x128xf32>
      tpu.vector_store %arg8[%c0_30, %c0_31], %52 {strides = array<i32>} : memref<16x128xf32, #tpu.memory_space<vmem>>, vector<16x128xf32>,
    } else {
    }
    return
  }
  func.func @transform_0(%arg0: i32, %arg1: i32) -> (i32, i32) {
    %c0_i32 = arith.constant 0 : i32
    return %arg0, %arg1 : i32, i32
  }
  func.func @transform_1(%arg0: i32, %arg1: i32) -> (i32, i32) {
    %c0_i32 = arith.constant 0 : i32
    %c0_i32_0 = arith.constant 0 : i32
    return %arg1, %c0_i32 : i32, i32
  }
  func.func @transform_2(%arg0: i32, %arg1: i32) -> (i32, i32) {
    %c0_i32 = arith.constant 0 : i32
    %c0_i32_0 = arith.constant 0 : i32
    %c0_i32_1 = arith.constant 0 : i32
    return %c0_i32, %c0_i32_0 : i32, i32
  }
  func.func @transform_3(%arg0: i32, %arg1: i32) -> (i32, i32) {
    %c0_i32 = arith.constant 0 : i32
    %c0_i32_0 = arith.constant 0 : i32
    %c0_i32_1 = arith.constant 0 : i32
    return %c0_i32, %c0_i32_0 : i32, i32
  }
  func.func @transform_4(%arg0: i32, %arg1: i32) -> (i32, i32) {
    %c0_i32 = arith.constant 0 : i32
    %c0_i32_0 = arith.constant 0 : i32
    %c0_i32_1 = arith.constant 0 : i32
    return %c0_i32, %c0_i32_0 : i32, i32
  }
  func.func @transform_5(%arg0: i32, %arg1: i32) -> (i32, i32) {
    %c0_i32 = arith.constant 0 : i32
    %c0_i32_0 = arith.constant 0 : i32
    %c0_i32_1 = arith.constant 0 : i32
    return %c0_i32, %c0_i32_0 : i32, i32
  }
  func.func @transform_6(%arg0: i32, %arg1: i32) -> (i32, i32) {
    %c0_i32 = arith.constant 0 : i32
    %c0_i32_0 = arith.constant 0 : i32
    return %arg0, %c0_i32 : i32, i32
  }
}

module attributes {stable_mosaic.version = 11 : i64} {
  func.func @_mlp_readout_kernel(%arg0: i32, %arg1: i32, %arg2: memref<16x32xbf16, #tpu.memory_space<vmem>>, %arg3: memref<32x16xbf16, #tpu.memory_space<vmem>>, %arg4: memref<2x16xf32, #tpu.memory_space<vmem>>, %arg5: memref<16x8xbf16, #tpu.memory_space<vmem>>, %arg6: memref<8x128xbf16, #tpu.memory_space<vmem>>, %arg7: memref<2x128xf32, #tpu.memory_space<vmem>>, %arg8: memref<16x128xf32, #tpu.memory_space<vmem>>, %arg9: memref<16x16xf32, #tpu.memory_space<vmem>>) attributes {dimension_semantics = [#tpu.dimension_semantics<parallel>, #tpu.dimension_semantics<arbitrary>], iteration_bounds = array<i64: 1, 1>, scalar_prefetch = 0 : i64, scratch_operands = 1 : i64, tpu.core_type = #tpu.core_type<tc>, window_params = [{transform_indices = @transform_0, window_bounds = array<i64: 16, 32>}, {transform_indices = @transform_1, window_bounds = array<i64: 32, 16>}, {pipeline_mode = #tpu.pipeline_mode<synchronous>, transform_indices = @transform_2, window_bounds = array<i64: 2, 16>}, {pipeline_mode = #tpu.pipeline_mode<synchronous>, transform_indices = @transform_3, window_bounds = array<i64: 16, 8>}, {pipeline_mode = #tpu.pipeline_mode<synchronous>, transform_indices = @transform_4, window_bounds = array<i64: 8, 128>}, {pipeline_mode = #tpu.pipeline_mode<synchronous>, transform_indices = @transform_5, window_bounds = array<i64: 2, 128>}, {transform_indices = @transform_6, window_bounds = array<i64: 16, 128>}]} {
    %c0_i32 = arith.constant 0 : i32
    %0 = arith.cmpi eq, %arg1, %c0_i32 : i32
    %1 = arith.extui %0 : i1 to i32
    %c0_i32_0 = arith.constant 0 : i32
    %2 = arith.cmpi ne, %1, %c0_i32_0 : i32
    scf.if %2 {
      %cst_10 = arith.constant 0.000000e+00 : f32
      %12 = vector.broadcast %cst_10 : f32 to vector<16x16xf32>
      %c0_11 = arith.constant 0 : index
      %c0_12 = arith.constant 0 : index
      %13 = vector.load %arg9[%c0_11, %c0_12] : memref<16x16xf32, #tpu.memory_space<vmem>>, vector<16x16xf32>
      tpu.vector_store %arg9[%c0_11, %c0_12], %12 {strides = array<i32>} : memref<16x16xf32, #tpu.memory_space<vmem>>, vector<16x16xf32>,
    } else {
    }
    %c0 = arith.constant 0 : index
    %c0_1 = arith.constant 0 : index
    %3 = vector.load %arg2[%c0, %c0_1] : memref<16x32xbf16, #tpu.memory_space<vmem>>, vector<16x32xbf16>
    %c0_2 = arith.constant 0 : index
    %c0_3 = arith.constant 0 : index
    %4 = vector.load %arg9[%c0_2, %c0_3] : memref<16x16xf32, #tpu.memory_space<vmem>>, vector<16x16xf32>
    %c0_4 = arith.constant 0 : index
    %c0_5 = arith.constant 0 : index
    %5 = vector.load %arg3[%c0_4, %c0_5] : memref<32x16xbf16, #tpu.memory_space<vmem>>, vector<32x16xbf16>
    %cst = arith.constant dense<0.000000e+00> : vector<16x16xf32>
    %6 = tpu.matmul %3, %5, %cst {dimension_numbers = #tpu.dot_dimension_numbers<[1], [0], [0], [1], [0, 0, 1, 1], [], []>} : vector<16x32xbf16>, vector<32x16xbf16>, vector<16x16xf32> -> vector<16x16xf32>
    %7 = arith.addf %4, %6 : vector<16x16xf32>
    %c0_6 = arith.constant 0 : index
    %c0_7 = arith.constant 0 : index
    %8 = vector.load %arg9[%c0_6, %c0_7] : memref<16x16xf32, #tpu.memory_space<vmem>>, vector<16x16xf32>
    tpu.vector_store %arg9[%c0_6, %c0_7], %7 {strides = array<i32>} : memref<16x16xf32, #tpu.memory_space<vmem>>, vector<16x16xf32>,
    %c0_i32_8 = arith.constant 0 : i32
    %9 = arith.cmpi eq, %arg1, %c0_i32_8 : i32
    %10 = arith.extui %9 : i1 to i32
    %c0_i32_9 = arith.constant 0 : i32
    %11 = arith.cmpi ne, %10, %c0_i32_9 : i32
    scf.if %11 {
      %c0_10 = arith.constant 0 : index
      %c0_11 = arith.constant 0 : index
      %12 = vector.load %arg4[%c0_10, %c0_11] : memref<2x16xf32, #tpu.memory_space<vmem>>, vector<2x16xf32>
      %c0_12 = arith.constant 0 : index
      %c0_13 = arith.constant 0 : index
      %13 = vector.load %arg7[%c0_12, %c0_13] : memref<2x128xf32, #tpu.memory_space<vmem>>, vector<2x128xf32>
      %c0_14 = arith.constant 0 : index
      %c0_15 = arith.constant 0 : index
      %14 = vector.load %arg9[%c0_14, %c0_15] : memref<16x16xf32, #tpu.memory_space<vmem>>, vector<16x16xf32>
      %15 = vector.extract_strided_slice %12 {offsets = [0, 0], sizes = [1, 16], strides = [1, 1]} : vector<2x16xf32> to vector<1x16xf32>
      %16 = vector.broadcast %15 : vector<1x16xf32> to vector<16x16xf32>
      %17 = arith.addf %14, %16 : vector<16x16xf32>
      %cst_16 = arith.constant 0.000000e+00 : f32
      %18 = vector.broadcast %cst_16 : f32 to vector<16x16xf32>
      %19 = arith.cmpf ogt, %17, %18 : vector<16x16xf32>
      %cst_17 = arith.constant 0.00999999977 : f32
      %20 = vector.broadcast %cst_17 : f32 to vector<16x16xf32>
      %21 = arith.mulf %20, %17 : vector<16x16xf32>
      %22 = arith.select %19, %17, %21 : vector<16x16xi1>, vector<16x16xf32>
      %23 = arith.truncf %22 : vector<16x16xf32> to vector<16x16xbf16>
      %c0_18 = arith.constant 0 : index
      %c0_19 = arith.constant 0 : index
      %24 = vector.load %arg5[%c0_18, %c0_19] : memref<16x8xbf16, #tpu.memory_space<vmem>>, vector<16x8xbf16>
      %cst_20 = arith.constant dense<0.000000e+00> : vector<16x8xf32>
      %25 = tpu.matmul %23, %24, %cst_20 {dimension_numbers = #tpu.dot_dimension_numbers<[1], [0], [0], [1], [0, 0, 1, 1], [], []>} : vector<16x16xbf16>, vector<16x8xbf16>, vector<16x8xf32> -> vector<16x8xf32>
      %26 = vector.extract_strided_slice %12 {offsets = [1, 0], sizes = [1, 8], strides = [1, 1]} : vector<2x16xf32> to vector<1x8xf32>
      %27 = vector.broadcast %26 : vector<1x8xf32> to vector<16x8xf32>
      %28 = arith.addf %25, %27 : vector<16x8xf32>
      %cst_21 = arith.constant 0.000000e+00 : f32
      %29 = vector.broadcast %cst_21 : f32 to vector<16x8xf32>
      %30 = arith.cmpf ogt, %28, %29 : vector<16x8xf32>
      %cst_22 = arith.constant 0.00999999977 : f32
      %31 = vector.broadcast %cst_22 : f32 to vector<16x8xf32>
      %32 = arith.mulf %31, %28 : vector<16x8xf32>
      %33 = arith.select %30, %28, %32 : vector<16x8xi1>, vector<16x8xf32>
      %34 = arith.truncf %33 : vector<16x8xf32> to vector<16x8xbf16>
      %c0_23 = arith.constant 0 : index
      %c0_24 = arith.constant 0 : index
      %35 = vector.load %arg6[%c0_23, %c0_24] : memref<8x128xbf16, #tpu.memory_space<vmem>>, vector<8x128xbf16>
      %cst_25 = arith.constant dense<0.000000e+00> : vector<16x128xf32>
      %36 = tpu.matmul %34, %35, %cst_25 {dimension_numbers = #tpu.dot_dimension_numbers<[1], [0], [0], [1], [0, 0, 1, 1], [], []>} : vector<16x8xbf16>, vector<8x128xbf16>, vector<16x128xf32> -> vector<16x128xf32>
      %37 = vector.extract_strided_slice %13 {offsets = [0, 0], sizes = [1, 128], strides = [1, 1]} : vector<2x128xf32> to vector<1x128xf32>
      %38 = vector.broadcast %37 : vector<1x128xf32> to vector<16x128xf32>
      %39 = arith.addf %36, %38 : vector<16x128xf32>
      %cst_26 = arith.constant 0.000000e+00 : f32
      %40 = vector.broadcast %cst_26 : f32 to vector<16x128xf32>
      %41 = arith.subf %40, %39 : vector<16x128xf32>
      %42 = math.exp %41 : vector<16x128xf32>
      %cst_27 = arith.constant 1.000000e+00 : f32
      %43 = vector.broadcast %cst_27 : f32 to vector<16x128xf32>
      %44 = arith.addf %43, %42 : vector<16x128xf32>
      %cst_28 = arith.constant 1.000000e+00 : f32
      %45 = vector.broadcast %cst_28 : f32 to vector<16x128xf32>
      %46 = arith.divf %45, %44 : vector<16x128xf32>
      %47 = vector.extract_strided_slice %13 {offsets = [1, 0], sizes = [1, 128], strides = [1, 1]} : vector<2x128xf32> to vector<1x128xf32>
      %cst_29 = arith.constant 0.000000e+00 : f32
      %48 = vector.broadcast %cst_29 : f32 to vector<1x128xf32>
      %49 = arith.cmpf ogt, %47, %48 : vector<1x128xf32>
      %50 = vector.shape_cast %49 : vector<1x128xi1> to vector<1x128xi1>
      %51 = vector.broadcast %50 : vector<1x128xi1> to vector<16x128xi1>
      %52 = arith.select %51, %46, %39 : vector<16x128xi1>, vector<16x128xf32>
      %c0_30 = arith.constant 0 : index
      %c0_31 = arith.constant 0 : index
      %53 = vector.load %arg8[%c0_30, %c0_31] : memref<16x128xf32, #tpu.memory_space<vmem>>, vector<16x128xf32>
      tpu.vector_store %arg8[%c0_30, %c0_31], %52 {strides = array<i32>} : memref<16x128xf32, #tpu.memory_space<vmem>>, vector<16x128xf32>,
    } else {
    }
    return
  }
  func.func @transform_0(%arg0: i32, %arg1: i32) -> (i32, i32) {
    %c0_i32 = arith.constant 0 : i32
    return %arg0, %arg1 : i32, i32
  }
  func.func @transform_1(%arg0: i32, %arg1: i32) -> (i32, i32) {
    %c0_i32 = arith.constant 0 : i32
    %c0_i32_0 = arith.constant 0 : i32
    return %arg1, %c0_i32 : i32, i32
  }
  func.func @transform_2(%arg0: i32, %arg1: i32) -> (i32, i32) {
    %c0_i32 = arith.constant 0 : i32
    %c0_i32_0 = arith.constant 0 : i32
    %c0_i32_1 = arith.constant 0 : i32
    return %c0_i32, %c0_i32_0 : i32, i32
  }
  func.func @transform_3(%arg0: i32, %arg1: i32) -> (i32, i32) {
    %c0_i32 = arith.constant 0 : i32
    %c0_i32_0 = arith.constant 0 : i32
    %c0_i32_1 = arith.constant 0 : i32
    return %c0_i32, %c0_i32_0 : i32, i32
  }
  func.func @transform_4(%arg0: i32, %arg1: i32) -> (i32, i32) {
    %c0_i32 = arith.constant 0 : i32
    %c0_i32_0 = arith.constant 0 : i32
    %c0_i32_1 = arith.constant 0 : i32
    return %c0_i32, %c0_i32_0 : i32, i32
  }
  func.func @transform_5(%arg0: i32, %arg1: i32) -> (i32, i32) {
    %c0_i32 = arith.constant 0 : i32
    %c0_i32_0 = arith.constant 0 : i32
    %c0_i32_1 = arith.constant 0 : i32
    return %c0_i32, %c0_i32_0 : i32, i32
  }
  func.func @transform_6(%arg0: i32, %arg1: i32) -> (i32, i32) {
    %c0_i32 = arith.constant 0 : i32
    %c0_i32_0 = arith.constant 0 : i32
    return %arg0, %c0_i32 : i32, i32
  }
}

</mosaic_0001>

<bundles_post_ra>
// kernel: mlp_readout_class_v2.1
= control target key start
LH: loop header
LB: loop body
LE: loop exit
PB: predicated region body
PF: predicated region fallthrough
CT: control target
= control target key end

     0   :  { %vm28_vm0 = vcmask 130048   ;;  %v319_v0 = vmov 0.0   ;;  %vm320_vm1 = vmmov 0   ;;  %vm56_vm2 = vcmask 261120   ;;  %s396_s1 = inlined_call_operand.vmem [shape: bf16[32,16], index: 1, kind: input, shape index: {}]   ;;  %s397_s0 = inlined_call_operand.vmem [shape: bf16[16,32], index: 0, kind: input, shape index: {}]   ;;  %s398_s3 = inlined_call_operand.vmem [shape: bf16[16,8], index: 3, kind: input, shape index: {}]   ;;  %s399_s2 = inlined_call_operand.vmem [shape: f32[2,16], index: 2, kind: input, shape index: {}]   ;;  %s400_s4 = inlined_call_operand.vmem [shape: bf16[8,128], index: 4, kind: input, shape index: {}]   ;;  %s401_s5 = inlined_call_operand.vmem [shape: f32[2,128], index: 5, kind: input, shape index: {}]   ;;  %s402_s6 = inlined_call_operand.vmem [shape: f32[16,128], index: 6, kind: output, shape index: {}]  }
   0x1   :  { %284 = vmatprep.subr.bf16.mxu0 %v319_v0  ;;  %v307_v1 = vld [vmem:[%s396_s1 + $0x8] sm:$0xff]   ;;  %288 = vmatprep.mubr.msk.bf16.mxu0 %vm320_vm1, %v319_v0  ;;  %29 = vst.msk [vmem:[#allocation2] sm:$0xff] %vm28_vm0, %v319_v0  ;;  %30 = vst.msk [vmem:[#allocation2 + $0x8] sm:$0xff] %vm28_vm0, %v319_v0  ;;  %v308_v2 = vld [vmem:[%s396_s1] sm:$0xff]   ;;  %v113_v5 = vlaneseq  ;;  %vm198_vm5 = vcmask 1043456   ;;  %vm194_vm8 = vcmask 64512  }
   0x2   :  { %292 = vmatprep.subr.bf16.mxu1 %v319_v0  ;;  %294 = vmatprep.mubr.msk.bf16.mxu1 %vm320_vm1, %v319_v0  ;;  %v309_v3 = vld [vmem:[%s397_s0] sm:$0xff]   ;;  %v321_v58 = vmov 0  }
   0x3   :  { %285 = vmatpush3.bf16.msra.mxu0 %v307_v1  ;;  %v310_v4 = vld [vmem:[%s398_s3] sm:$0xff]   ;;  %v373_v7 = vshrl.u32 %v113_v5, 7 }
   0x4   :  { %286 = vmatprep.subr.bf16.mxu0 %v319_v0  ;;  %293 = vmatpush3.bf16.msra.mxu1 %v310_v4  ;;  %v109_v14 = vld [vmem:[%s399_s2] sm:$0x3] }
   0x5   :  { %298 = vmatprep.subr.bf16.mxu1 %v319_v0  ;;  %v115_v12 = vsub.s32 0, %v373_v7  ;;  %v189_v27 = vld [vmem:[%s400_s4] sm:$0xf]  ;;  %v130_v29 = vsub.s32 1, %v373_v7 }
   0x6   :  { %v200_v28 = vsel %vm198_vm5, %v189_v27, 0  ;;  %v110_v42 = vld [vmem:[%s401_s5] sm:$0x3] }
   0x7   :  { %287 = vmatpush3.bf16.msra.mxu0 %v308_v2  ;;  %v116_v17 = vrot.slane %v109_v14, %v115_v12  ;;  %v131_v30 = vrot.slane %v109_v14, %v130_v29  ;;  %v193_v43 = vrot.slane %v110_v42, %v115_v12  ;;  %vm255_vm9 = vcmp.gt.f32.partialorder %v110_v42, 0.0 }
   0x8   :  { %v33_v6 = vld [vmem:[#allocation2] sm:$0xff]  ;;  %v34_v11 = vld [vmem:[#allocation2 + $0x8] sm:$0xff]  ;;  %v256_v59 = vsel %vm255_vm9, 1, %v321_v58 }
   0x9   :  { %v260_v60 = vrot.slane %v256_v59, %v130_v29 }
   0xa   :  { %289 = vmatmul.mubr.msk.bf16.vlgmr.msra.gmra.mxu0 %vm56_vm2, %v309_v3 }
   0xb   :  { %vm261_vm10 = vcmp.eq.s32.totalorder %v260_v60, 1 }
  0xca   :  { %v94_v8 = vpop.f32.mrf.mxu0 }
  0xcb   :  { %v101_v9 = vadd.f32 %v94_v8, %v33_v6 }
  0xcc   :  { %v290_v10 = vpop.f32.mrf.mxu0 }
  0xcd   :  { %104 = vst.msk [vmem:[#allocation2] sm:$0xff] %vm28_vm0, %v101_v9 }
  0xce   :  { %v97_v13 = vpop.f32.mrf.mxu0 }
  0xcf   :  { %v102_v15 = vadd.f32 %v97_v13, %v34_v11 }
  0xd0   :  { %v291_v16 = vpop.f32.mrf.mxu0 }
  0xd1   :  { %105 = vst.msk [vmem:[#allocation2 + $0x8] sm:$0xff] %vm28_vm0, %v102_v15 }
  0xd4   :  { %v111_v18 = vld [vmem:[#allocation2] sm:$0xff] }
  0xd5   :  { %v117_v19 = vadd.f32 %v116_v17, %v111_v18 }
  0xd7   :  { %v121_v22 = vmul.f32 0.01, %v117_v19  ;;  %vm119_vm3 = vcmp.gt.f32.partialorder %v117_v19, 0.0 }
  0xd8   :  { %v112_v20 = vld [vmem:[#allocation2 + $0x8] sm:$0xff] }
  0xd9   :  { %v118_v21 = vadd.f32 %v116_v17, %v112_v20  ;;  %v123_v24 = vsel %vm119_vm3, %v117_v19, %v121_v22 }
  0xdb   :  { %vm120_vm4 = vcmp.gt.f32.partialorder %v118_v21, 0.0  ;;  %v122_v23 = vmul.f32 0.01, %v118_v21 }
  0xdd   :  { %v124_v25 = vsel %vm120_vm4, %v118_v21, %v122_v23 }
  0xde   :  { %v125_v26 = vpack.c.bf16 %v124_v25, %v123_v24 }
  0xe0   :  { %295 = vmatmul.mubr.msk.bf16.vlgmr.msra.gmra.mxu1 %vm28_vm0, %v125_v26 }
  0xe1   :  { %300 = vmatprep.mubr.msk.bf16.mxu1 %vm320_vm1, %v319_v0  ;;  %299 = vmatpush3.bf16.msra.mxu1 %v200_v28 }
 0x1a0   :  { %v175_v31 = vpop.f32.mrf.mxu1 }
 0x1a1   :  { %v176_v32 = vadd.f32 %v175_v31, %v131_v30 }
 0x1a2   :  { %v296_v33 = vpop.f32.mrf.mxu1 }
 0x1a3   :  { %v184_v35 = vmul.f32 0.01, %v176_v32  ;;  %vm182_vm6 = vcmp.gt.f32.partialorder %v176_v32, 0.0 }
 0x1a4   :  { %v178_v34 = vpop.f32.mrf.mxu1 }
 0x1a5   :  { %v179_v36 = vadd.f32 %v178_v34, %v131_v30  ;;  %v186_v39 = vsel %vm182_vm6, %v176_v32, %v184_v35 }
 0x1a6   :  { %v297_v37 = vpop.f32.mrf.mxu1 }
 0x1a7   :  { %vm183_vm7 = vcmp.gt.f32.partialorder %v179_v36, 0.0  ;;  %v185_v38 = vmul.f32 0.01, %v179_v36 }
 0x1a9   :  { %v187_v40 = vsel %vm183_vm7, %v179_v36, %v185_v38 }
 0x1aa   :  { %v188_v41 = vpack.c.bf16 %v187_v40, %v186_v39 }
 0x1ac   :  { %301 = vmatmul.mubr.msk.bf16.vlgmr.msra.gmra.mxu1 %vm194_vm8, %v188_v41 }
 0x26c   :  { %v236_v44 = vpop.f32.mrf.mxu1 }
 0x26d   :  { %v237_v45 = vadd.f32 %v236_v44, %v193_v43 }
 0x26e   :  { %v302_v46 = vpop.f32.mrf.mxu1 }
 0x26f   :  { %v243_v47 = vsub.f32 0.0, %v237_v45 }
 0x270   :  { %v239_v48 = vpop.f32.mrf.mxu1 }
 0x271   :  { %v245_v49 = vmul.f32 1.442695, %v243_v47  ;;  %v240_v50 = vadd.f32 %v239_v48, %v193_v43 }
 0x272   :  { %v303_v51 = vpop.f32.mrf.mxu1 }
 0x273   :  { %311 = vpow2.f32 %v245_v49  ;;  %v244_v52 = vsub.f32 0.0, %v240_v50 }
 0x275   :  { %v247_v53 = vmul.f32 1.442695, %v244_v52 }
 0x277   :  { %313 = vpow2.f32 %v247_v53 }
 0x280   :  { %v312_v54 = vpop.eup %311 }
 0x281   :  { %v249_v55 = vadd.f32 1.0, %v312_v54 }
 0x283   :  { %315 = vrcp.f32 %v249_v55 }
 0x284   :  { %v314_v56 = vpop.eup %313 }
 0x285   :  { %v250_v57 = vadd.f32 1.0, %v314_v56 }
 0x287   :  { %317 = vrcp.f32 %v250_v57 }
 0x290   :  { %v316_v61 = vpop.eup %315 }
 0x291   :  { %v262_v62 = vsel %vm261_vm10, %v316_v61, %v237_v45 }
 0x292   :  { %264 = vst [vmem:[%s402_s6] sm:$0xff] %v262_v62 }
 0x294   :  { %v318_v63 = vpop.eup %317 }
 0x295   :  { %v263_v0 = vsel %vm261_vm10, %v318_v63, %v240_v50 }
 0x296   :  { %265 = vst [vmem:[%s402_s6 + $0x8] sm:$0xff] %v263_v0 }

// kernel: mlp_readout_class_v2.1
= control target key start
LH: loop header
LB: loop body
LE: loop exit
PB: predicated region body
PF: predicated region fallthrough
CT: control target
= control target key end

     0   :  { %vm28_vm0 = vcmask 130048   ;;  %v319_v0 = vmov 0.0   ;;  %vm320_vm1 = vmmov 0   ;;  %vm56_vm2 = vcmask 261120   ;;  %s396_s1 = inlined_call_operand.vmem [shape: bf16[32,16], index: 1, kind: input, shape index: {}]   ;;  %s397_s0 = inlined_call_operand.vmem [shape: bf16[16,32], index: 0, kind: input, shape index: {}]   ;;  %s398_s3 = inlined_call_operand.vmem [shape: bf16[16,8], index: 3, kind: input, shape index: {}]   ;;  %s399_s2 = inlined_call_operand.vmem [shape: f32[2,16], index: 2, kind: input, shape index: {}]   ;;  %s400_s4 = inlined_call_operand.vmem [shape: bf16[8,128], index: 4, kind: input, shape index: {}]   ;;  %s401_s5 = inlined_call_operand.vmem [shape: f32[2,128], index: 5, kind: input, shape index: {}]   ;;  %s402_s6 = inlined_call_operand.vmem [shape: f32[16,128], index: 6, kind: output, shape index: {}]  }
   0x1   :  { %284 = vmatprep.subr.bf16.mxu0 %v319_v0  ;;  %v307_v1 = vld [vmem:[%s396_s1 + $0x8] sm:$0xff]   ;;  %288 = vmatprep.mubr.msk.bf16.mxu0 %vm320_vm1, %v319_v0  ;;  %29 = vst.msk [vmem:[#allocation2] sm:$0xff] %vm28_vm0, %v319_v0  ;;  %30 = vst.msk [vmem:[#allocation2 + $0x8] sm:$0xff] %vm28_vm0, %v319_v0  ;;  %v308_v2 = vld [vmem:[%s396_s1] sm:$0xff]   ;;  %v113_v5 = vlaneseq  ;;  %vm198_vm5 = vcmask 1043456   ;;  %vm194_vm8 = vcmask 64512  }
   0x2   :  { %292 = vmatprep.subr.bf16.mxu1 %v319_v0  ;;  %294 = vmatprep.mubr.msk.bf16.mxu1 %vm320_vm1, %v319_v0  ;;  %v309_v3 = vld [vmem:[%s397_s0] sm:$0xff]   ;;  %v321_v58 = vmov 0  }
   0x3   :  { %285 = vmatpush3.bf16.msra.mxu0 %v307_v1  ;;  %v310_v4 = vld [vmem:[%s398_s3] sm:$0xff]   ;;  %v373_v7 = vshrl.u32 %v113_v5, 7 }
   0x4   :  { %286 = vmatprep.subr.bf16.mxu0 %v319_v0  ;;  %293 = vmatpush3.bf16.msra.mxu1 %v310_v4  ;;  %v109_v14 = vld [vmem:[%s399_s2] sm:$0x3] }
   0x5   :  { %298 = vmatprep.subr.bf16.mxu1 %v319_v0  ;;  %v115_v12 = vsub.s32 0, %v373_v7  ;;  %v189_v27 = vld [vmem:[%s400_s4] sm:$0xf]  ;;  %v130_v29 = vsub.s32 1, %v373_v7 }
   0x6   :  { %v200_v28 = vsel %vm198_vm5, %v189_v27, 0  ;;  %v110_v42 = vld [vmem:[%s401_s5] sm:$0x3] }
   0x7   :  { %287 = vmatpush3.bf16.msra.mxu0 %v308_v2  ;;  %v116_v17 = vrot.slane %v109_v14, %v115_v12  ;;  %v131_v30 = vrot.slane %v109_v14, %v130_v29  ;;  %v193_v43 = vrot.slane %v110_v42, %v115_v12  ;;  %vm255_vm9 = vcmp.gt.f32.partialorder %v110_v42, 0.0 }
   0x8   :  { %v33_v6 = vld [vmem:[#allocation2] sm:$0xff]  ;;  %v34_v11 = vld [vmem:[#allocation2 + $0x8] sm:$0xff]  ;;  %v256_v59 = vsel %vm255_vm9, 1, %v321_v58 }
   0x9   :  { %v260_v60 = vrot.slane %v256_v59, %v130_v29 }
   0xa   :  { %289 = vmatmul.mubr.msk.bf16.vlgmr.msra.gmra.mxu0 %vm56_vm2, %v309_v3 }
   0xb   :  { %vm261_vm10 = vcmp.eq.s32.totalorder %v260_v60, 1 }
  0xca   :  { %v94_v8 = vpop.f32.mrf.mxu0 }
  0xcb   :  { %v101_v9 = vadd.f32 %v94_v8, %v33_v6 }
  0xcc   :  { %v290_v10 = vpop.f32.mrf.mxu0 }
  0xcd   :  { %104 = vst.msk [vmem:[#allocation2] sm:$0xff] %vm28_vm0, %v101_v9 }
  0xce   :  { %v97_v13 = vpop.f32.mrf.mxu0 }
  0xcf   :  { %v102_v15 = vadd.f32 %v97_v13, %v34_v11 }
  0xd0   :  { %v291_v16 = vpop.f32.mrf.mxu0 }
  0xd1   :  { %105 = vst.msk [vmem:[#allocation2 + $0x8] sm:$0xff] %vm28_vm0, %v102_v15 }
  0xd4   :  { %v111_v18 = vld [vmem:[#allocation2] sm:$0xff] }
  0xd5   :  { %v117_v19 = vadd.f32 %v116_v17, %v111_v18 }
  0xd7   :  { %v121_v22 = vmul.f32 0.01, %v117_v19  ;;  %vm119_vm3 = vcmp.gt.f32.partialorder %v117_v19, 0.0 }
  0xd8   :  { %v112_v20 = vld [vmem:[#allocation2 + $0x8] sm:$0xff] }
  0xd9   :  { %v118_v21 = vadd.f32 %v116_v17, %v112_v20  ;;  %v123_v24 = vsel %vm119_vm3, %v117_v19, %v121_v22 }
  0xdb   :  { %vm120_vm4 = vcmp.gt.f32.partialorder %v118_v21, 0.0  ;;  %v122_v23 = vmul.f32 0.01, %v118_v21 }
  0xdd   :  { %v124_v25 = vsel %vm120_vm4, %v118_v21, %v122_v23 }
  0xde   :  { %v125_v26 = vpack.c.bf16 %v124_v25, %v123_v24 }
  0xe0   :  { %295 = vmatmul.mubr.msk.bf16.vlgmr.msra.gmra.mxu1 %vm28_vm0, %v125_v26 }
  0xe1   :  { %300 = vmatprep.mubr.msk.bf16.mxu1 %vm320_vm1, %v319_v0  ;;  %299 = vmatpush3.bf16.msra.mxu1 %v200_v28 }
 0x1a0   :  { %v175_v31 = vpop.f32.mrf.mxu1 }
 0x1a1   :  { %v176_v32 = vadd.f32 %v175_v31, %v131_v30 }
 0x1a2   :  { %v296_v33 = vpop.f32.mrf.mxu1 }
 0x1a3   :  { %v184_v35 = vmul.f32 0.01, %v176_v32  ;;  %vm182_vm6 = vcmp.gt.f32.partialorder %v176_v32, 0.0 }
 0x1a4   :  { %v178_v34 = vpop.f32.mrf.mxu1 }
 0x1a5   :  { %v179_v36 = vadd.f32 %v178_v34, %v131_v30  ;;  %v186_v39 = vsel %vm182_vm6, %v176_v32, %v184_v35 }
 0x1a6   :  { %v297_v37 = vpop.f32.mrf.mxu1 }
 0x1a7   :  { %vm183_vm7 = vcmp.gt.f32.partialorder %v179_v36, 0.0  ;;  %v185_v38 = vmul.f32 0.01, %v179_v36 }
 0x1a9   :  { %v187_v40 = vsel %vm183_vm7, %v179_v36, %v185_v38 }
 0x1aa   :  { %v188_v41 = vpack.c.bf16 %v187_v40, %v186_v39 }
 0x1ac   :  { %301 = vmatmul.mubr.msk.bf16.vlgmr.msra.gmra.mxu1 %vm194_vm8, %v188_v41 }
 0x26c   :  { %v236_v44 = vpop.f32.mrf.mxu1 }
 0x26d   :  { %v237_v45 = vadd.f32 %v236_v44, %v193_v43 }
 0x26e   :  { %v302_v46 = vpop.f32.mrf.mxu1 }
 0x26f   :  { %v243_v47 = vsub.f32 0.0, %v237_v45 }
 0x270   :  { %v239_v48 = vpop.f32.mrf.mxu1 }
 0x271   :  { %v245_v49 = vmul.f32 1.442695, %v243_v47  ;;  %v240_v50 = vadd.f32 %v239_v48, %v193_v43 }
 0x272   :  { %v303_v51 = vpop.f32.mrf.mxu1 }
 0x273   :  { %311 = vpow2.f32 %v245_v49  ;;  %v244_v52 = vsub.f32 0.0, %v240_v50 }
 0x275   :  { %v247_v53 = vmul.f32 1.442695, %v244_v52 }
 0x277   :  { %313 = vpow2.f32 %v247_v53 }
 0x280   :  { %v312_v54 = vpop.eup %311 }
 0x281   :  { %v249_v55 = vadd.f32 1.0, %v312_v54 }
 0x283   :  { %315 = vrcp.f32 %v249_v55 }
 0x284   :  { %v314_v56 = vpop.eup %313 }
 0x285   :  { %v250_v57 = vadd.f32 1.0, %v314_v56 }
 0x287   :  { %317 = vrcp.f32 %v250_v57 }
 0x290   :  { %v316_v61 = vpop.eup %315 }
 0x291   :  { %v262_v62 = vsel %vm261_vm10, %v316_v61, %v237_v45 }
 0x292   :  { %264 = vst [vmem:[%s402_s6] sm:$0xff] %v262_v62 }
 0x294   :  { %v318_v63 = vpop.eup %317 }
 0x295   :  { %v263_v0 = vsel %vm261_vm10, %v318_v63, %v240_v50 }
 0x296   :  { %265 = vst [vmem:[%s402_s6 + $0x8] sm:$0xff] %v263_v0 }

</bundles_post_ra>
